<compile_context>
chip_gen: v7x
topology: tpu7x:2x2x1
jax: 0.10.0
libtpu: 0.0.40
codegen_flags: <defaults>
</compile_context>

<pallas_src>
import jax
import jax.numpy as jnp
from jax.experimental import pallas as pl
from jax.experimental.pallas import tpu as pltpu


# ----------------------------- Pallas kernels --------------------------------

def _make_from_rgb_kernel(cdim):
    """Build the 1x1-conv (channel-mix) kernel for a given input channel count."""
    if cdim <= 8:
        # Tiny contraction dim: unrolled VPU multiply-add, no MXU involved.
        # TODO(synk): on v7x specifically, an MXU path (or stride-0 broadcast
        # loads) may beat this VPU chain; keep VPU branch as the portable default.
        def kernel(x_ref, w_ref, b_ref, o_ref):
            # x_ref: (1, cdim, T)  w_ref: (ch, cdim)  b_ref: (ch, 1)  o_ref: (1, ch, T)
            x = x_ref[0]                                   # (cdim, T)
            # Bias fused into the accumulator init (saves one (ch,T) pass).
            acc = b_ref[...] + w_ref[:, 0:1] * x[0:1, :]   # (ch,1)+(ch,1)*(1,T) -> (ch,T)
            for k in range(1, cdim):                       # static, unrolled
                acc = acc + w_ref[:, k:k + 1] * x[k:k + 1, :]
            o_ref[0] = acc
    else:
        # General case: MXU matmul with f32 accumulation, bias fused in the store.
        def kernel(x_ref, w_ref, b_ref, o_ref):
            o_ref[0] = (
                jnp.dot(w_ref[...], x_ref[0], preferred_element_type=jnp.float32)
                + b_ref[...]
            )
    return kernel


# ------------------------------ tiling helpers --------------------------------

def _cdiv(a, b):
    return (a + b - 1) // b


def _pad8(c):
    return ((c + 7) // 8) * 8


def _pick_hw_tile(hw, n, cdim, ch, *, max_lanes=32768, tile_budget_bytes=8 << 20):
    """Pick the lane tile T over the flattened H*W axis.

    T is either the full extent (small images) or a large multiple of 128
    bounded by `max_lanes` and a per-grid-step VMEM byte budget (double-
    buffered input + output blocks, f32, sublane-padded).  A cdiv grid masks
    the partial last block, so T does NOT need to divide hw.
    """
    # Bytes per lane per grid step: 2x (double buffer) * (in + out block rows) * 4 B.
    per_lane_bytes = 2 * (_pad8(cdim) + _pad8(ch)) * 4
    t_budget = max(128, tile_budget_bytes // per_lane_bytes)
    T = min(max_lanes, t_budget)
    T = max(128, (T // 128) * 128)        # multiple of 128 (lane width)

    if hw > T:
        return T                           # many tiles; partial last one is masked

    # Whole H*W fits in a single tile.
    if n >= 2 or hw <= 128:
        return hw                          # already >= 2 grid cells (or can't split)

    # N == 1: split H*W so both v7x TensorCores get work.
    n_blocks_128 = _cdiv(hw, 128)
    return min(hw, _cdiv(n_blocks_128, 2) * 128)


# ------------------------------ call wrapper ----------------------------------

def from_rgb_forward(rgb, weight, bias, *, max_lanes=32768):
    """FromRGB forward: y = Conv2d(cdim, ch, kernel=1, stride=1, pad=0)(rgb).

    rgb:    (N, cdim, H, W) float32, NCHW (PyTorch layout)
    weight: (ch, cdim, 1, 1) float32
    bias:   (ch,) float32
    returns (N, ch, H, W) float32
    """
    N, cdim, H, W = rgb.shape
    ch = weight.shape[0]
    hw = H * W

    T = _pick_hw_tile(hw, N, cdim, ch, max_lanes=max_lanes)
    n_tiles = _cdiv(hw, T)

    x = rgb.reshape(N, cdim, hw)          # free reshape, stays NCHW-contiguous
    w2 = weight.reshape(ch, cdim)
    b2 = bias.reshape(ch, 1)

    out = pl.pallas_call(
        _make_from_rgb_kernel(cdim),
        out_shape=jax.ShapeDtypeStruct((N, ch, hw), jnp.float32),
        grid=(N, n_tiles),
        in_specs=[
            pl.BlockSpec((1, cdim, T), lambda n, t: (n, 0, t)),
            pl.BlockSpec((ch, cdim), lambda n, t: (0, 0)),
            pl.BlockSpec((ch, 1), lambda n, t: (0, 0)),
        ],
        out_specs=pl.BlockSpec((1, ch, T), lambda n, t: (n, 0, t)),
        compiler_params=pltpu.CompilerParams(
            dimension_semantics=("parallel", "parallel"),
            vmem_limit_bytes=32 * 1024 * 1024,
        ),
    )(x, w2, b2)

    return out.reshape(N, ch, H, W)


# --------------------------------- driver --------------------------------------

if __name__ == "__main__":
    key = jax.random.PRNGKey(0)
    kx, kw, kb = jax.random.split(key, 3)

    # FromRGB(cdim=3, out_channels=16, feature_size=16) on a batch of 2.
    N, cdim, ch, sz = 2, 3, 16, 16
    rgb = jax.random.normal(kx, (N, cdim, sz, sz), jnp.float32)

    # TODO(synk): the custom `weight_init` helper is not provided in the spec;
    # parameters are initialized deterministically from PRNGKey(0) instead.
    weight = 0.1 * jax.random.normal(kw, (ch, cdim, 1, 1), jnp.float32)
    bias = 0.05 * jax.random.normal(kb, (ch,), jnp.float32)

    y = from_rgb_forward(rgb, weight, bias)
    jax.block_until_ready(y)

    assert y.shape == (N, ch, sz, sz), y.shape

    # pure-JAX reference: 1x1 conv == per-pixel channel mix
    ref = jnp.einsum("oc,nchw->nohw", weight[:, :, 0, 0], rgb) + bias[None, :, None, None]
    assert bool(jnp.isfinite(y).all())
    assert bool(jnp.allclose(y, ref, atol=1e-5, rtol=1e-5))

    print("KERNEL_OK")
</pallas_src>

<mosaic_0001>
module attributes {stable_mosaic.version = 11 : i64} {
  func.func @kernel(%arg0: i32, %arg1: i32, %arg2: memref<1x3x256xf32, #tpu.memory_space<vmem>>, %arg3: memref<16x3xf32, #tpu.memory_space<vmem>>, %arg4: memref<16x1xf32, #tpu.memory_space<vmem>>, %arg5: memref<1x16x256xf32, #tpu.memory_space<vmem>>) attributes {dimension_semantics = [#tpu.dimension_semantics<parallel>, #tpu.dimension_semantics<parallel>], iteration_bounds = array<i64: 2, 1>, scalar_prefetch = 0 : i64, scratch_operands = 0 : i64, tpu.core_type = #tpu.core_type<tc>, window_params = [{transform_indices = @transform_0, window_bounds = array<i64: 1, 3, 256>}, {pipeline_mode = #tpu.pipeline_mode<synchronous>, transform_indices = @transform_1, window_bounds = array<i64: 16, 3>}, {pipeline_mode = #tpu.pipeline_mode<synchronous>, transform_indices = @transform_2, window_bounds = array<i64: 16, 1>}, {transform_indices = @transform_3, window_bounds = array<i64: 1, 16, 256>}]} {
    %c0 = arith.constant 0 : index
    %c0_0 = arith.constant 0 : index
    %c0_1 = arith.constant 0 : index
    %0 = vector.load %arg2[%c0, %c0_0, %c0_1] : memref<1x3x256xf32, #tpu.memory_space<vmem>>, vector<1x3x256xf32>
    %1 = vector.shape_cast %0 : vector<1x3x256xf32> to vector<3x256xf32>
    %c0_2 = arith.constant 0 : index
    %c0_3 = arith.constant 0 : index
    %2 = vector.load %arg4[%c0_2, %c0_3] : memref<16x1xf32, #tpu.memory_space<vmem>>, vector<16x1xf32>
    %c0_4 = arith.constant 0 : index
    %c0_5 = arith.constant 0 : index
    %3 = vector.load %arg3[%c0_4, %c0_5] : memref<16x3xf32, #tpu.memory_space<vmem>>, vector<16x1xf32>
    %4 = vector.extract_strided_slice %1 {offsets = [0, 0], sizes = [1, 256], strides = [1, 1]} : vector<3x256xf32> to vector<1x256xf32>
    %5 = vector.broadcast %3 : vector<16x1xf32> to vector<16x256xf32>
    %6 = vector.broadcast %4 : vector<1x256xf32> to vector<16x256xf32>
    %7 = arith.mulf %5, %6 : vector<16x256xf32>
    %8 = vector.broadcast %2 : vector<16x1xf32> to vector<16x256xf32>
    %9 = arith.addf %8, %7 : vector<16x256xf32>
    %c0_6 = arith.constant 0 : index
    %c1 = arith.constant 1 : index
    %10 = vector.load %arg3[%c0_6, %c1] : memref<16x3xf32, #tpu.memory_space<vmem>>, vector<16x1xf32>
    %11 = vector.extract_strided_slice %1 {offsets = [1, 0], sizes = [1, 256], strides = [1, 1]} : vector<3x256xf32> to vector<1x256xf32>
    %12 = vector.broadcast %10 : vector<16x1xf32> to vector<16x256xf32>
    %13 = vector.broadcast %11 : vector<1x256xf32> to vector<16x256xf32>
    %14 = arith.mulf %12, %13 : vector<16x256xf32>
    %15 = arith.addf %9, %14 : vector<16x256xf32>
    %c0_7 = arith.constant 0 : index
    %c2 = arith.constant 2 : index
    %16 = vector.load %arg3[%c0_7, %c2] : memref<16x3xf32, #tpu.memory_space<vmem>>, vector<16x1xf32>
    %17 = vector.extract_strided_slice %1 {offsets = [2, 0], sizes = [1, 256], strides = [1, 1]} : vector<3x256xf32> to vector<1x256xf32>
    %18 = vector.broadcast %16 : vector<16x1xf32> to vector<16x256xf32>
    %19 = vector.broadcast %17 : vector<1x256xf32> to vector<16x256xf32>
    %20 = arith.mulf %18, %19 : vector<16x256xf32>
    %21 = arith.addf %15, %20 : vector<16x256xf32>
    %c0_8 = arith.constant 0 : index
    %c0_9 = arith.constant 0 : index
    %c0_10 = arith.constant 0 : index
    %22 = vector.load %arg5[%c0_8, %c0_9, %c0_10] : memref<1x16x256xf32, #tpu.memory_space<vmem>>, vector<1x16x256xf32>
    %23 = vector.shape_cast %22 : vector<1x16x256xf32> to vector<16x256xf32>
    %24 = vector.shape_cast %21 : vector<16x256xf32> to vector<1x16x256xf32>
    tpu.vector_store %arg5[%c0_8, %c0_9, %c0_10], %24 {strides = array<i32>} : memref<1x16x256xf32, #tpu.memory_space<vmem>>, vector<1x16x256xf32>,
    return
  }
  func.func @transform_0(%arg0: i32, %arg1: i32) -> (i32, i32, i32) {
    %c0_i32 = arith.constant 0 : i32
    %c0_i32_0 = arith.constant 0 : i32
    return %arg0, %c0_i32, %arg1 : i32, i32, i32
  }
  func.func @transform_1(%arg0: i32, %arg1: i32) -> (i32, i32) {
    %c0_i32 = arith.constant 0 : i32
    %c0_i32_0 = arith.constant 0 : i32
    %c0_i32_1 = arith.constant 0 : i32
    return %c0_i32, %c0_i32_0 : i32, i32
  }
  func.func @transform_2(%arg0: i32, %arg1: i32) -> (i32, i32) {
    %c0_i32 = arith.constant 0 : i32
    %c0_i32_0 = arith.constant 0 : i32
    %c0_i32_1 = arith.constant 0 : i32
    return %c0_i32, %c0_i32_0 : i32, i32
  }
  func.func @transform_3(%arg0: i32, %arg1: i32) -> (i32, i32, i32) {
    %c0_i32 = arith.constant 0 : i32
    %c0_i32_0 = arith.constant 0 : i32
    return %arg0, %c0_i32, %arg1 : i32, i32, i32
  }
}

</mosaic_0001>

<bundles_post_ra>
// kernel: tpu_custom_call.1
= control target key start
LH: loop header
LB: loop body
LE: loop exit
PB: predicated region body
PF: predicated region fallthrough
CT: control target
= control target key end

     0   :  { %8 = vsyncpa [#allocation3], 0  ;;  %s737_s0 = inlined_call_operand.vmem [shape: f32[2,3,256], index: 0, kind: input, shape index: {}]   ;;  %s738_s1 = inlined_call_operand.vmem [shape: f32[16,3], index: 1, kind: input, shape index: {}]   ;;  %s739_s2 = inlined_call_operand.vmem [shape: f32[16,1], index: 2, kind: input, shape index: {}]   ;;  %s740_s3 = inlined_call_operand.hbm [shape: f32[2,16,256], index: 3, kind: output, shape index: {}]  }
   0x1   :  { %10 = vsyncpa [#allocation3 + $0x1], 0  ;;  %s606_s12 = smov 0   ;;  %s608_s13 = smov 0  }
   0x2   :  { %s610_s14 = smov 0   ;;  %s612_s15 = smov 0  }
   0x3   :  { %s614_s16 = smov 0   ;;  %s616_s17 = smov 0  }
   0x4 LB: > { %s419_s18 = sadd.s32 4294967295, %s578_s17   ;;  %s420_s19 = sadd.s32 4294967294, %s578_s17   ;;  %s578_s17 = sphi %s616_s17, %s16_s17   ;;  %s574_s16 = sphi %s614_s16, %s747_s16   ;;  %s570_s15 = sphi %s612_s15, %s746_s15   ;;  %s566_s14 = sphi %s610_s14, %s745_s14   ;;  %s562_s13 = sphi %s608_s13, %s744_s13   ;;  %s558_s12 = sphi %s606_s12, %s743_s12  }
   0x5   : > { %s28_s20 = sadd.s32 1, %s574_s16  ;;  %s107_s21 = sadd.s32 1, %s566_s14 }
   0x6   : > { %p30_p0 = scmp.ge.s32.totalorder %s28_s20, 2  ;;  %p117_p1 = scmp.ne.s32.totalorder %s566_s14, %s562_s13 }
   0x7   : > { %p118_p2 = scmp.eq.s32.totalorder %s419_s18, 1  ;;  %p123_p3 = scmp.ne.s32.totalorder %s562_s13, %s558_s12 }
   0x8   : > { %s749_s20 = smov (%p30_p0, %s28_s20), 0  ;;  %p124_p5 = scmp.eq.s32.totalorder %s420_s19, 1 }
   0x9   : > { %p646_p4 = por %p118_p2, %p117_p1  ;;  %s102_s23 = ssub.s32 %s574_s16, %s749_s20 }
   0xa   : > { %p423_p6 = scmp.ge.s32.totalorder %s578_s17, 1  ;;  %p105_p7 = scmp.eq.s32.totalorder %s102_s23, 0 }
   0xb   : > { %p653_p8 = por %p124_p5, %p123_p3  ;;  %p161_p9 = scmp.lt.s32.totalorder %s578_s17, 3 }
   0xc   : > { %s659_s25 = scalar_select %p105_p7, %s566_s14, %s107_s21  }
   0xd   : > { %p162_p10 = pnand %p423_p6, %p161_p9 }
   0xe   : > { %v203_v0 = vld [vmem:[%s738_s1] sm:$0xff] (!%p162_p10)  ;;  %v580_v2 = vmov (!%p162_p10), 0   ;;  %v204_v3 = vld [vmem:[%s738_s1 + $0x8] sm:$0xff] (!%p162_p10)  ;;  %v581_v5 = vmov (!%p162_p10), 1   ;;  %v582_v6 = vmov (!%p162_p10), 2   ;;  %p190_p11 = scmp.lt.s32.totalorder (!%p162_p10), %s570_s15, 1  ;;  %v216_v7 = vlaneseq (!%p162_p10) }
   0xf   : > { %165 = sbr.rel (%p162_p10) target bundleno = 178 (0xb2), region = 32  ;;  %v201_v1 = vld [vmem:[%s739_s2] sm:$0xff] (!%p162_p10)  ;;  %495 = vset.pattern.permute.xlu1 (!%p162_p10), %v580_v2  ;;  %494 = vset.pattern.permute.xlu0 (!%p162_p10), %v580_v2  ;;  %v202_v4 = vld [vmem:[%s739_s2 + $0x8] sm:$0xff] (!%p162_p10)  ;;  %s186_s18 = sand.u32 (!%p162_p10), 1, %s562_s13  }
  0x10   : > { %207 = vperm.xlu0 (!%p162_p10), %494, %v203_v0   ;;  %240 = vperm.xlu1 (!%p162_p10), %495, %v201_v1   ;;  %v217_v8 = vshrl.u32 (!%p162_p10), %v216_v7, 7  ;;  %s424_s19 = sshll.u32 (!%p162_p10), %s186_s18, 5  ;;  %s433_s26 = sshll.u32 (!%p162_p10), %s570_s15, 9 }
  0x11   : > { %s188_s21 = scalar_lea.vmem (!%p162_p10), [#allocation2], %s424_s19  ;;  %s691_s29 = scalar_lea.sflag (!%p162_p10), [#allocation3], %s186_s18 }
  0x12   : > { %v218_v9 = vsub.s32 (!%p162_p10), 0, %v217_v8  ;;  %v222_v10 = vsub.s32 (!%p162_p10), 4, %v217_v8  ;;  %v262_v12 = vsub.s32 (!%p162_p10), 1, %v217_v8  ;;  %v266_v13 = vsub.s32 (!%p162_p10), 5, %v217_v8  ;;  %s340_s23 = sshll.u32 (!%p162_p10), %s188_s21, 4  ;;  %s583_s4 = smov (!%p162_p10), [#allocation2]   ;;  %s682_s23 = int_to_ptr.vmem [resolvable:$true] %s340_s23 }
  0x13   : > { %v296_v20 = vsub.s32 (!%p162_p10), 2, %v217_v8  ;;  %v300_v21 = vsub.s32 (!%p162_p10), 6, %v217_v8  ;;  %s500_s30 = scalar_lea.vmem (!%p162_p10), %s682_s23, 512  ;;  %s504_s5 = sshll.u32 (!%p162_p10), %s583_s4, 4  ;;  %s505_s5 = int_to_ptr.vmem [resolvable:$false] %s504_s5 }
  0x14   : > { %212 = vperm.xlu0 (!%p162_p10), %494, %v204_v3   ;;  %245 = vperm.xlu1 (!%p162_p10), %495, %v202_v4   ;;  %p501_p12 = scmp.ne.s32.totalorder (!%p162_p10), %s682_s23, %s500_s30  ;;  %s506_s6 = scalar_lea.vmem (!%p162_p10), %s505_s5, 1024 }
  0x15   : > { %p507_p1 = scmp.lt.s32.totalorder (!%p162_p10), %s682_s23, %s505_s5  ;;  %p508_p2 = scmp.lt.s32.totalorder (!%p162_p10), %s506_s6, %s500_s30 }
  0x16   : > { %s191_s7 = scalar_select %p190_p11, %s570_s15, 1 }
  0x17   : > { %s687_s15 = scalar_lea.hbm %s740_s3, %s433_s26  ;;  %p502_p13 = pnand %p501_p12, %p646_p4 }
  0x18   : > { %496 = vset.pattern.permute.xlu0 %v581_v5  ;;  %497 = vset.pattern.permute.xlu1 %v581_v5  ;;  %s432_s8 = sshll.u32 %s191_s7, 3  ;;  %p509_p3 = por %p508_p2, %p507_p1 }
  0x19   : > { %253 = vperm.xlu0 %496, %v203_v0   ;;  %257 = vperm.xlu1 %497, %v204_v3   ;;  %s197_s11 = scalar_lea.vmem %s737_s0, %s432_s8  ;;  %p503_p0 = pneg %p502_p13 }
  0x1a   : > { %v200_v11 = vld [vmem:[%s197_s11] sm:$0x77] }
  0x1b   : > { %v219_v15 = vrot.slane %v200_v11, %v218_v9  ;;  %v223_v16 = vrot.slane %v200_v11, %v222_v10  ;;  %v263_v18 = vrot.slane %v200_v11, %v262_v12  ;;  %v267_v19 = vrot.slane %v200_v11, %v266_v13  ;;  %p510_p5 = pnand %p509_p3, %p503_p0 }
  0x1c   : > { %v297_v28 = vrot.slane %v200_v11, %v296_v20  ;;  %v301_v29 = vrot.slane %v200_v11, %v300_v21 }
  0x1d   : > { %499 = vset.pattern.permute.xlu0 %v582_v6  ;;  %498 = vset.pattern.permute.xlu1 %v582_v6  ;;  %v229_v22 = vrot.slane %v219_v15, %v218_v9  ;;  %v233_v23 = vrot.slane %v223_v16, %v218_v9  ;;  %v273_v26 = vrot.slane %v263_v18, %v262_v12 }
  0x1e   : > { %291 = vperm.xlu0 %499, %v204_v3   ;;  %287 = vperm.xlu1 %498, %v203_v0   ;;  %v277_v27 = vrot.slane %v267_v19, %v262_v12  ;;  %v307_v40 = vrot.slane %v297_v28, %v296_v20  ;;  %v311_v41 = vrot.slane %v301_v29, %v296_v20 }
  0x8f   : > { %v208_v14 = vpop.permute.xlu0 %207  ;;  %v241_v17 = vpop.permute.xlu1 %240 }
  0x90   : > { %v234_v30 = vmul.f32 %v229_v22, %v208_v14  ;;  %v235_v31 = vmul.f32 %v233_v23, %v208_v14 }
  0x92   : > { %v248_v42 = vadd.f32 %v241_v17, %v234_v30  ;;  %v249_v43 = vadd.f32 %v241_v17, %v235_v31 }
  0x93   : > { %v213_v24 = vpop.permute.xlu0 %212  ;;  %v246_v25 = vpop.permute.xlu1 %245 }
  0x94   : > { %v236_v32 = vmul.f32 %v229_v22, %v213_v24  ;;  %v237_v33 = vmul.f32 %v233_v23, %v213_v24 }
  0x96   : > { %v250_v44 = vadd.f32 %v246_v25, %v236_v32  ;;  %v251_v45 = vadd.f32 %v246_v25, %v237_v33 }
  0x98   : > { %v254_v34 = vpop.permute.xlu0 %253  ;;  %v258_v35 = vpop.permute.xlu1 %257 }
  0x99   : > { %v278_v36 = vmul.f32 %v273_v26, %v254_v34  ;;  %v279_v37 = vmul.f32 %v277_v27, %v254_v34  ;;  %v280_v38 = vmul.f32 %v273_v26, %v258_v35  ;;  %v281_v39 = vmul.f32 %v277_v27, %v258_v35 }
  0x9b   : > { %v282_v46 = vadd.f32 %v278_v36, %v248_v42  ;;  %v283_v47 = vadd.f32 %v279_v37, %v249_v43  ;;  %v284_v48 = vadd.f32 %v280_v38, %v250_v44  ;;  %v285_v49 = vadd.f32 %v281_v39, %v251_v45 }
  0x9d   : > { %v292_v50 = vpop.permute.xlu0 %291  ;;  %v288_v51 = vpop.permute.xlu1 %287 }
  0x9e   : > { %v314_v52 = vmul.f32 %v307_v40, %v292_v50  ;;  %v315_v53 = vmul.f32 %v311_v41, %v292_v50  ;;  %v312_v54 = vmul.f32 %v307_v40, %v288_v51  ;;  %v313_v55 = vmul.f32 %v311_v41, %v288_v51 }
  0xa0   : > { %v318_v56 = vadd.f32 %v314_v52, %v284_v48  ;;  %v319_v57 = vadd.f32 %v315_v53, %v285_v49  ;;  %v316_v58 = vadd.f32 %v312_v54, %v282_v46  ;;  %v317_v59 = vadd.f32 %v313_v55, %v283_v47 }
  0xa2   : > { %322 = vst [vmem:[%s188_s21 + $0x10] sm:$0xff] %v318_v56  ;;  %323 = vst [vmem:[%s188_s21 + $0x18] sm:$0xff] %v319_v57 }
  0xa3   : > { %320 = vst [vmem:[%s188_s21] sm:$0xff] %v316_v58  ;;  %321 = vst [vmem:[%s188_s21 + $0x8] sm:$0xff] %v317_v59 }
  0xa4   : > { %513 = shalt.err (!%p510_p5)
}
  0xa5   : > { %s514_s7 = scalar_lea.hbm %s687_s15, 512  ;;  %s518_s10 = scalar_lea.hbm %s740_s3, 1024 }
  0xa6   : > { %p515_p6 = scmp.ne.s32.totalorder %s687_s15, %s514_s7  ;;  %p519_p10 = scmp.lt.u32.totalorder %s687_s15, %s740_s3 }
  0xa7   : > { %p520_p11 = scmp.lt.u32.totalorder %s518_s10, %s514_s7  ;;  %p522_p13 = scmp.lt.u32.totalorder %s514_s7, %s687_s15 }
  0xa8   : > { %p516_p7 = pnand %p515_p6, %p646_p4 }
  0xa9   : > { %p521_p12 = por %p520_p11, %p519_p10 }
  0xaa   : > { %p517_p9 = pneg %p516_p7 }
  0xab   : > { %p523_p0 = por %p522_p13, %p521_p12 }
  0xad   : > { %p524_p1 = pnand %p523_p0, %p517_p9 }
  0xaf   : > { %527 = shalt.err (!%p524_p1)
}
  0xb0   : > { %s584_s19 = smov 256   ;;  %s585_s21 = smov 16  }
  0xb1   : > { %434 = dma.vmem_to_hbm [thread:$0]  (%p646_p4), %s682_s23, 512, %s687_s15, %s691_s29, %s584_s19, %s584_s19, %s585_s21  }
  0xb2 PF: > { %p440_p2 = scmp.ge.s32.totalorder %s578_s17, 2  ;;  %s355_s26 = sand.u32 1, %s558_s12  }
  0xb3   : > { %s356_s27 = scalar_lea.sflag [#allocation3], %s355_s26 }
  0xb4   : > { %p437_p3 = pnand %p440_p2, %p653_p8 }
  0xb6   : > { %553 = dma.done.wait (!%p437_p3), %s356_s27, 512  }
  0xb7   : > { %555 = vsyncadd (!%p437_p3), %s356_s27, 4294966784  ;;  %s16_s17 = sadd.s32 1, %s578_s17   ;;  %s743_s12 = smov %s562_s13 }
  0xb8   : > { %p13_p5 = scmp.ge.s32.totalorder %s16_s17, 4   ;;  %s744_s13 = smov %s566_s14 }
  0xb9   : > { %s745_s14 = smov %s659_s25  ;;  %s746_s15 = smov %s574_s16 }
  0xba   : > { %s747_s16 = smov %s749_s20  ;;  %15 = sbr.rel (!%p13_p5) target bundleno = 4 (0x4), region = 67 }
  0xc1   :  { %361 = vsyncpa [#allocation3], 1 }
  0xc2   :  { %363 = vsyncpa [#allocation3 + $0x1], 1 }

</bundles_post_ra>
